<compile_context>
chip_gen: v6e
topology: v6e:2x2x1
jax: 0.10.0
libtpu: 0.0.40
codegen_flags: <defaults>
</compile_context>

<pallas_src>
import math
import functools

import jax
import jax.numpy as jnp
from jax.experimental import pallas as pl
from jax.experimental.pallas import tpu as pltpu


# ---------------------------------------------------------------------------
# Kernel
# ---------------------------------------------------------------------------
def _qkv_attn_kernel(q_ref, k_ref, v_ref, o_ref, m_ref, l_ref, acc_ref,
                     *, scale2, heads):
    """One (batch, head-block, q-block) tile; online softmax over the kv axis.

    q_ref:  [HB, ch, TQ]   (native dtype)
    k_ref:  [HB, ch, KB]
    v_ref:  [HB, ch, KB]
    o_ref:  [HB, ch, TQ]
    m_ref/l_ref: [HB, 1, TQ] f32 scratch, acc_ref: [HB, ch, TQ] f32 scratch.
    """
    kv_idx = pl.program_id(3)

    @pl.when(kv_idx == 0)
    def _():
        m_ref[...] = jnp.full_like(m_ref, -jnp.inf)
        l_ref[...] = jnp.zeros_like(l_ref)
        acc_ref[...] = jnp.zeros_like(acc_ref)

    for h in range(heads):                     # static unroll over head block
        q_h = q_ref[h]                         # [ch, TQ]  native dtype
        k_h = k_ref[h]                         # [ch, KB]
        v_h = v_ref[h]                         # [ch, KB]

        # Transposed logits: w[s, t] = sum_c k[c, s] * q[c, t].
        # Keeping the long q-axis on lanes means m/l/acc never need a
        # per-step relayout; only k (the small [ch, KB] operand) is in the
        # "lhs-transposed" MXU form.
        w = jax.lax.dot_general(
            k_h, q_h,
            dimension_numbers=(((0,), (0,)), ((), ())),
            preferred_element_type=jnp.float32,
        ) * scale2                                              # [KB, TQ] f32

        m_prev = m_ref[h]                                       # [1, TQ]
        m_new = jnp.maximum(m_prev, jnp.max(w, axis=0, keepdims=True))
        alpha = jnp.exp(m_prev - m_new)                         # [1, TQ]
        p = jnp.exp(w - m_new)                                  # [KB, TQ] f32
        l_ref[h] = alpha * l_ref[h] + jnp.sum(p, axis=0, keepdims=True)
        m_ref[h] = m_new

        # acc[c, t] += sum_s v[c, s] * p[s, t]  -- plain [ch,KB]@[KB,TQ] matmul.
        pv = jax.lax.dot_general(
            v_h, p.astype(v_h.dtype),
            dimension_numbers=(((1,), (0,)), ((), ())),
            preferred_element_type=jnp.float32,
        )                                                       # [ch, TQ] f32
        acc_ref[h] = alpha * acc_ref[h] + pv

    @pl.when(kv_idx == pl.num_programs(3) - 1)
    def _():
        inv_l = pl.reciprocal(l_ref[...], approx=True)          # [HB, 1, TQ]
        o_ref[...] = (acc_ref[...] * inv_l).astype(o_ref.dtype)


# ---------------------------------------------------------------------------
# Block-size selection
# ---------------------------------------------------------------------------
def _pick_seq_block(T, cap):
    """Largest multiple-of-128 divisor of T that is <= cap, else T (full)."""
    if T <= cap:
        return T
    best = None
    d = 128
    while d <= cap:
        if T % d == 0:
            best = d
        d += 128
    return best if best is not None else T


def _pick_head_block(H, ch, tq_blk, kv_blk, itemsize, budget=14 << 20):
    """Largest divisor of H (<= 8) whose per-step working set fits the budget."""
    best = 1
    for hb in range(1, min(H, 8) + 1):
        if H % hb:
            continue
        io = 2 * hb * ch * (2 * tq_blk + 2 * kv_blk) * itemsize  # dbl-buffered q,out,k,v
        scratch = 4 * hb * (ch * tq_blk + 2 * 8 * tq_blk)        # acc + padded m,l (f32)
        logits = 4 * 2 * kv_blk * tq_blk * 2                     # ~2 heads of w/p in flight
        if io + scratch + logits <= budget:
            best = hb
    return best


# ---------------------------------------------------------------------------
# Wrapper
# ---------------------------------------------------------------------------
def qkv_attention(qkv, n_heads):
    """Pallas equivalent of QKVAttention.forward.

    qkv: [N, 3*H*C, T]  ->  returns [N, H*C, T]
    """
    bs, width, length = qkv.shape
    assert width % (3 * n_heads) == 0
    ch = width // (3 * n_heads)
    scale2 = float(1.0 / math.sqrt(ch))        # (1/ch**0.25)**2 folded once

    # Free metadata reshape (splits a row-major axis, no data movement).
    qkv4 = qkv.reshape(bs, 3 * n_heads, ch, length)

    tq_blk = _pick_seq_block(length, 1024)     # q-length tile
    kv_blk = _pick_seq_block(length, 512)      # kv-length tile
    hb = _pick_head_block(n_heads, ch, tq_blk, kv_blk, qkv.dtype.itemsize)
    nhb = n_heads // hb
    ntq = length // tq_blk
    nkv = length // kv_blk

    def q_map(n, h, tq, kv):
        return (n, h, 0, tq)

    def k_map(n, h, tq, kv):
        return (n, nhb + h, 0, kv)

    def v_map(n, h, tq, kv):
        return (n, 2 * nhb + h, 0, kv)

    def o_map(n, h, tq, kv):
        return (n, h, 0, tq)

    kernel = functools.partial(_qkv_attn_kernel, scale2=scale2, heads=hb)

    out4 = pl.pallas_call(
        kernel,
        out_shape=jax.ShapeDtypeStruct((bs, n_heads, ch, length), qkv.dtype),
        grid=(bs, nhb, ntq, nkv),
        in_specs=[
            pl.BlockSpec((None, hb, ch, tq_blk), q_map),
            pl.BlockSpec((None, hb, ch, kv_blk), k_map),
            pl.BlockSpec((None, hb, ch, kv_blk), v_map),
        ],
        out_specs=pl.BlockSpec((None, hb, ch, tq_blk), o_map),
        scratch_shapes=[
            pltpu.VMEM((hb, 1, tq_blk), jnp.float32),    # running max m
            pltpu.VMEM((hb, 1, tq_blk), jnp.float32),    # running sum l
            pltpu.VMEM((hb, ch, tq_blk), jnp.float32),   # output accumulator
        ],
        compiler_params=pltpu.CompilerParams(
            dimension_semantics=("parallel", "parallel", "parallel", "arbitrary"),
            vmem_limit_bytes=32 * 1024 * 1024,
        ),
    )(qkv4, qkv4, qkv4)

    # Free metadata reshape back to the PyTorch output layout [N, H*C, T].
    return out4.reshape(bs, n_heads * ch, length)


# ---------------------------------------------------------------------------
# Pure-JAX reference (mirrors the PyTorch forward)
# ---------------------------------------------------------------------------
def _reference(qkv, n_heads):
    bs, width, length = qkv.shape
    ch = width // (3 * n_heads)
    q, k, v = jnp.split(qkv, 3, axis=1)
    scale = 1.0 / math.sqrt(math.sqrt(ch))
    qh = (q * scale).reshape(bs * n_heads, ch, length)
    kh = (k * scale).reshape(bs * n_heads, ch, length)
    vh = v.reshape(bs * n_heads, ch, length)
    w = jnp.einsum('bct,bcs->bts', qh, kh)
    w = jax.nn.softmax(w.astype(jnp.float32), axis=-1).astype(qkv.dtype)
    a = jnp.einsum('bts,bcs->bct', w, vh)
    return a.reshape(bs, -1, length)


if __name__ == "__main__":
    key = jax.random.PRNGKey(0)
    k1, k2 = jax.random.split(key)

    # Small shape: batch=2, heads=2, head-dim=8, seq=16  (width = 3*H*C = 48).
    N, H, C, T = 2, 2, 8, 16
    qkv_small = jax.random.normal(k1, (N, 3 * H * C, T), dtype=jnp.float32)
    out = jax.block_until_ready(qkv_attention(qkv_small, n_heads=H))
    ref = _reference(qkv_small, n_heads=H)
    assert out.shape == (N, H * C, T)
    assert jnp.allclose(out, ref, atol=2e-3, rtol=2e-3), (
        "max abs err=%f" % float(jnp.max(jnp.abs(out - ref))))

    # Longer sequence: exercises the q-tiled + kv-tiled online-softmax path.
    N2, H2, C2, T2 = 1, 2, 8, 2048
    qkv_long = jax.random.normal(k2, (N2, 3 * H2 * C2, T2), dtype=jnp.float32)
    out2 = jax.block_until_ready(qkv_attention(qkv_long, n_heads=H2))
    ref2 = _reference(qkv_long, n_heads=H2)
    assert out2.shape == (N2, H2 * C2, T2)
    assert jnp.allclose(out2, ref2, atol=2e-3, rtol=2e-3), (
        "max abs err=%f" % float(jnp.max(jnp.abs(out2 - ref2))))

    print("KERNEL_OK")
</pallas_src>

<mosaic_0001>
module attributes {stable_mosaic.version = 11 : i64} {
  func.func @_qkv_attn_kernel(%arg0: i32, %arg1: i32, %arg2: i32, %arg3: i32, %arg4: memref<1x2x8x16xf32, #tpu.memory_space<vmem>>, %arg5: memref<1x2x8x16xf32, #tpu.memory_space<vmem>>, %arg6: memref<1x2x8x16xf32, #tpu.memory_space<vmem>>, %arg7: memref<1x2x8x16xf32, #tpu.memory_space<vmem>>, %arg8: memref<2x1x16xf32, #tpu.memory_space<vmem>>, %arg9: memref<2x1x16xf32, #tpu.memory_space<vmem>>, %arg10: memref<2x8x16xf32, #tpu.memory_space<vmem>>) attributes {dimension_semantics = [#tpu.dimension_semantics<parallel>, #tpu.dimension_semantics<parallel>, #tpu.dimension_semantics<parallel>, #tpu.dimension_semantics<arbitrary>], iteration_bounds = array<i64: 2, 1, 1, 1>, scalar_prefetch = 0 : i64, scratch_operands = 3 : i64, tpu.core_type = #tpu.core_type<tc>, window_params = [{transform_indices = @transform_0, window_bounds = array<i64: 1, 2, 8, 16>}, {transform_indices = @transform_1, window_bounds = array<i64: 1, 2, 8, 16>}, {transform_indices = @transform_2, window_bounds = array<i64: 1, 2, 8, 16>}, {transform_indices = @transform_3, window_bounds = array<i64: 1, 2, 8, 16>}]} {
    %c0_i32 = arith.constant 0 : i32
    %0 = arith.cmpi eq, %arg3, %c0_i32 : i32
    %1 = arith.extui %0 : i1 to i32
    %c0_i32_0 = arith.constant 0 : i32
    %2 = arith.cmpi ne, %1, %c0_i32_0 : i32
    scf.if %2 {
      %cst_70 = arith.constant 0xFF800000 : f32
      %86 = vector.broadcast %cst_70 : f32 to vector<2x1x16xf32>
      %c0_71 = arith.constant 0 : index
      %c0_72 = arith.constant 0 : index
      %c0_73 = arith.constant 0 : index
      %87 = vector.load %arg8[%c0_71, %c0_72, %c0_73] : memref<2x1x16xf32, #tpu.memory_space<vmem>>, vector<2x1x16xf32>
      tpu.vector_store %arg8[%c0_71, %c0_72, %c0_73], %86 {strides = array<i32>} : memref<2x1x16xf32, #tpu.memory_space<vmem>>, vector<2x1x16xf32>,
      %cst_74 = arith.constant 0.000000e+00 : f32
      %88 = vector.broadcast %cst_74 : f32 to vector<2x1x16xf32>
      %c0_75 = arith.constant 0 : index
      %c0_76 = arith.constant 0 : index
      %c0_77 = arith.constant 0 : index
      %89 = vector.load %arg9[%c0_75, %c0_76, %c0_77] : memref<2x1x16xf32, #tpu.memory_space<vmem>>, vector<2x1x16xf32>
      tpu.vector_store %arg9[%c0_75, %c0_76, %c0_77], %88 {strides = array<i32>} : memref<2x1x16xf32, #tpu.memory_space<vmem>>, vector<2x1x16xf32>,
      %cst_78 = arith.constant 0.000000e+00 : f32
      %90 = vector.broadcast %cst_78 : f32 to vector<2x8x16xf32>
      %c0_79 = arith.constant 0 : index
      %c0_80 = arith.constant 0 : index
      %c0_81 = arith.constant 0 : index
      %91 = vector.load %arg10[%c0_79, %c0_80, %c0_81] : memref<2x8x16xf32, #tpu.memory_space<vmem>>, vector<2x8x16xf32>
      tpu.vector_store %arg10[%c0_79, %c0_80, %c0_81], %90 {strides = array<i32>} : memref<2x8x16xf32, #tpu.memory_space<vmem>>, vector<2x8x16xf32>,
    } else {
    }
    %c0 = arith.constant 0 : index
    %c0_1 = arith.constant 0 : index
    %c0_2 = arith.constant 0 : index
    %c0_3 = arith.constant 0 : index
    %3 = vector.load %arg4[%c0, %c0_1, %c0_2, %c0_3] : memref<1x2x8x16xf32, #tpu.memory_space<vmem>>, vector<1x1x8x16xf32>
    %4 = vector.shape_cast %3 : vector<1x1x8x16xf32> to vector<8x16xf32>
    %c0_4 = arith.constant 0 : index
    %c0_5 = arith.constant 0 : index
    %c0_6 = arith.constant 0 : index
    %c0_7 = arith.constant 0 : index
    %5 = vector.load %arg5[%c0_4, %c0_5, %c0_6, %c0_7] : memref<1x2x8x16xf32, #tpu.memory_space<vmem>>, vector<1x1x8x16xf32>
    %6 = vector.shape_cast %5 : vector<1x1x8x16xf32> to vector<8x16xf32>
    %c0_8 = arith.constant 0 : index
    %c0_9 = arith.constant 0 : index
    %c0_10 = arith.constant 0 : index
    %c0_11 = arith.constant 0 : index
    %7 = vector.load %arg6[%c0_8, %c0_9, %c0_10, %c0_11] : memref<1x2x8x16xf32, #tpu.memory_space<vmem>>, vector<1x1x8x16xf32>
    %8 = vector.shape_cast %7 : vector<1x1x8x16xf32> to vector<8x16xf32>
    %cst = arith.constant dense<0.000000e+00> : vector<16x16xf32>
    %9 = tpu.matmul %6, %4, %cst {dimension_numbers = #tpu.dot_dimension_numbers<[0], [0], [1], [1], [0, 1, 1, 1], [], []>} : vector<8x16xf32>, vector<8x16xf32>, vector<16x16xf32> -> vector<16x16xf32>
    %cst_12 = arith.constant 0.353553385 : f32
    %10 = vector.broadcast %cst_12 : f32 to vector<16x16xf32>
    %11 = arith.mulf %9, %10 : vector<16x16xf32>
    %c0_13 = arith.constant 0 : index
    %c0_14 = arith.constant 0 : index
    %c0_15 = arith.constant 0 : index
    %12 = vector.load %arg8[%c0_13, %c0_14, %c0_15] : memref<2x1x16xf32, #tpu.memory_space<vmem>>, vector<1x1x16xf32>
    %13 = vector.shape_cast %12 : vector<1x1x16xf32> to vector<1x16xf32>
    %cst_16 = arith.constant dense<0xFF800000> : vector<16xf32>
    %14 = vector.multi_reduction <maximumf>, %11, %cst_16 [0] : vector<16x16xf32> to vector<16xf32>
    %15 = vector.shape_cast %14 : vector<16xf32> to vector<1x16xf32>
    %16 = arith.maximumf %13, %15 : vector<1x16xf32>
    %17 = arith.subf %13, %16 : vector<1x16xf32>
    %18 = math.exp %17 : vector<1x16xf32>
    %19 = vector.broadcast %16 : vector<1x16xf32> to vector<16x16xf32>
    %20 = arith.subf %11, %19 : vector<16x16xf32>
    %21 = math.exp %20 : vector<16x16xf32>
    %c0_17 = arith.constant 0 : index
    %c0_18 = arith.constant 0 : index
    %c0_19 = arith.constant 0 : index
    %22 = vector.load %arg9[%c0_17, %c0_18, %c0_19] : memref<2x1x16xf32, #tpu.memory_space<vmem>>, vector<1x1x16xf32>
    %23 = vector.shape_cast %22 : vector<1x1x16xf32> to vector<1x16xf32>
    %24 = arith.mulf %18, %23 : vector<1x16xf32>
    %cst_20 = arith.constant dense<0.000000e+00> : vector<16xf32>
    %25 = vector.multi_reduction <add>, %21, %cst_20 [0] : vector<16x16xf32> to vector<16xf32>
    %26 = vector.shape_cast %25 : vector<16xf32> to vector<1x16xf32>
    %27 = arith.addf %24, %26 : vector<1x16xf32>
    %c0_21 = arith.constant 0 : index
    %c0_22 = arith.constant 0 : index
    %c0_23 = arith.constant 0 : index
    %28 = vector.load %arg9[%c0_21, %c0_22, %c0_23] : memref<2x1x16xf32, #tpu.memory_space<vmem>>, vector<1x1x16xf32>
    %29 = vector.shape_cast %28 : vector<1x1x16xf32> to vector<1x16xf32>
    %30 = vector.shape_cast %27 : vector<1x16xf32> to vector<1x1x16xf32>
    tpu.vector_store %arg9[%c0_21, %c0_22, %c0_23], %30 {strides = array<i32>} : memref<2x1x16xf32, #tpu.memory_space<vmem>>, vector<1x1x16xf32>,
    %c0_24 = arith.constant 0 : index
    %c0_25 = arith.constant 0 : index
    %c0_26 = arith.constant 0 : index
    %31 = vector.load %arg8[%c0_24, %c0_25, %c0_26] : memref<2x1x16xf32, #tpu.memory_space<vmem>>, vector<1x1x16xf32>
    %32 = vector.shape_cast %31 : vector<1x1x16xf32> to vector<1x16xf32>
    %33 = vector.shape_cast %16 : vector<1x16xf32> to vector<1x1x16xf32>
    tpu.vector_store %arg8[%c0_24, %c0_25, %c0_26], %33 {strides = array<i32>} : memref<2x1x16xf32, #tpu.memory_space<vmem>>, vector<1x1x16xf32>,
    %cst_27 = arith.constant dense<0.000000e+00> : vector<8x16xf32>
    %34 = tpu.matmul %8, %21, %cst_27 {dimension_numbers = #tpu.dot_dimension_numbers<[1], [0], [0], [1], [0, 0, 1, 1], [], []>} : vector<8x16xf32>, vector<16x16xf32>, vector<8x16xf32> -> vector<8x16xf32>
    %c0_28 = arith.constant 0 : index
    %c0_29 = arith.constant 0 : index
    %c0_30 = arith.constant 0 : index
    %35 = vector.load %arg10[%c0_28, %c0_29, %c0_30] : memref<2x8x16xf32, #tpu.memory_space<vmem>>, vector<1x8x16xf32>
    %36 = vector.shape_cast %35 : vector<1x8x16xf32> to vector<8x16xf32>
    %37 = vector.broadcast %18 : vector<1x16xf32> to vector<8x16xf32>
    %38 = arith.mulf %37, %36 : vector<8x16xf32>
    %39 = arith.addf %38, %34 : vector<8x16xf32>
    %c0_31 = arith.constant 0 : index
    %c0_32 = arith.constant 0 : index
    %c0_33 = arith.constant 0 : index
    %40 = vector.load %arg10[%c0_31, %c0_32, %c0_33] : memref<2x8x16xf32, #tpu.memory_space<vmem>>, vector<1x8x16xf32>
    %41 = vector.shape_cast %40 : vector<1x8x16xf32> to vector<8x16xf32>
    %42 = vector.shape_cast %39 : vector<8x16xf32> to vector<1x8x16xf32>
    tpu.vector_store %arg10[%c0_31, %c0_32, %c0_33], %42 {strides = array<i32>} : memref<2x8x16xf32, #tpu.memory_space<vmem>>, vector<1x8x16xf32>,
    %c0_34 = arith.constant 0 : index
    %c1 = arith.constant 1 : index
    %c0_35 = arith.constant 0 : index
    %c0_36 = arith.constant 0 : index
    %43 = vector.load %arg4[%c0_34, %c1, %c0_35, %c0_36] : memref<1x2x8x16xf32, #tpu.memory_space<vmem>>, vector<1x1x8x16xf32>
    %44 = vector.shape_cast %43 : vector<1x1x8x16xf32> to vector<8x16xf32>
    %c0_37 = arith.constant 0 : index
    %c1_38 = arith.constant 1 : index
    %c0_39 = arith.constant 0 : index
    %c0_40 = arith.constant 0 : index
    %45 = vector.load %arg5[%c0_37, %c1_38, %c0_39, %c0_40] : memref<1x2x8x16xf32, #tpu.memory_space<vmem>>, vector<1x1x8x16xf32>
    %46 = vector.shape_cast %45 : vector<1x1x8x16xf32> to vector<8x16xf32>
    %c0_41 = arith.constant 0 : index
    %c1_42 = arith.constant 1 : index
    %c0_43 = arith.constant 0 : index
    %c0_44 = arith.constant 0 : index
    %47 = vector.load %arg6[%c0_41, %c1_42, %c0_43, %c0_44] : memref<1x2x8x16xf32, #tpu.memory_space<vmem>>, vector<1x1x8x16xf32>
    %48 = vector.shape_cast %47 : vector<1x1x8x16xf32> to vector<8x16xf32>
    %cst_45 = arith.constant dense<0.000000e+00> : vector<16x16xf32>
    %49 = tpu.matmul %46, %44, %cst_45 {dimension_numbers = #tpu.dot_dimension_numbers<[0], [0], [1], [1], [0, 1, 1, 1], [], []>} : vector<8x16xf32>, vector<8x16xf32>, vector<16x16xf32> -> vector<16x16xf32>
    %cst_46 = arith.constant 0.353553385 : f32
    %50 = vector.broadcast %cst_46 : f32 to vector<16x16xf32>
    %51 = arith.mulf %49, %50 : vector<16x16xf32>
    %c1_47 = arith.constant 1 : index
    %c0_48 = arith.constant 0 : index
    %c0_49 = arith.constant 0 : index
    %52 = vector.load %arg8[%c1_47, %c0_48, %c0_49] : memref<2x1x16xf32, #tpu.memory_space<vmem>>, vector<1x1x16xf32>
    %53 = vector.shape_cast %52 : vector<1x1x16xf32> to vector<1x16xf32>
    %cst_50 = arith.constant dense<0xFF800000> : vector<16xf32>
    %54 = vector.multi_reduction <maximumf>, %51, %cst_50 [0] : vector<16x16xf32> to vector<16xf32>
    %55 = vector.shape_cast %54 : vector<16xf32> to vector<1x16xf32>
    %56 = arith.maximumf %53, %55 : vector<1x16xf32>
    %57 = arith.subf %53, %56 : vector<1x16xf32>
    %58 = math.exp %57 : vector<1x16xf32>
    %59 = vector.broadcast %56 : vector<1x16xf32> to vector<16x16xf32>
    %60 = arith.subf %51, %59 : vector<16x16xf32>
    %61 = math.exp %60 : vector<16x16xf32>
    %c1_51 = arith.constant 1 : index
    %c0_52 = arith.constant 0 : index
    %c0_53 = arith.constant 0 : index
    %62 = vector.load %arg9[%c1_51, %c0_52, %c0_53] : memref<2x1x16xf32, #tpu.memory_space<vmem>>, vector<1x1x16xf32>
    %63 = vector.shape_cast %62 : vector<1x1x16xf32> to vector<1x16xf32>
    %64 = arith.mulf %58, %63 : vector<1x16xf32>
    %cst_54 = arith.constant dense<0.000000e+00> : vector<16xf32>
    %65 = vector.multi_reduction <add>, %61, %cst_54 [0] : vector<16x16xf32> to vector<16xf32>
    %66 = vector.shape_cast %65 : vector<16xf32> to vector<1x16xf32>
    %67 = arith.addf %64, %66 : vector<1x16xf32>
    %c1_55 = arith.constant 1 : index
    %c0_56 = arith.constant 0 : index
    %c0_57 = arith.constant 0 : index
    %68 = vector.load %arg9[%c1_55, %c0_56, %c0_57] : memref<2x1x16xf32, #tpu.memory_space<vmem>>, vector<1x1x16xf32>
    %69 = vector.shape_cast %68 : vector<1x1x16xf32> to vector<1x16xf32>
    %70 = vector.shape_cast %67 : vector<1x16xf32> to vector<1x1x16xf32>
    tpu.vector_store %arg9[%c1_55, %c0_56, %c0_57], %70 {strides = array<i32>} : memref<2x1x16xf32, #tpu.memory_space<vmem>>, vector<1x1x16xf32>,
    %c1_58 = arith.constant 1 : index
    %c0_59 = arith.constant 0 : index
    %c0_60 = arith.constant 0 : index
    %71 = vector.load %arg8[%c1_58, %c0_59, %c0_60] : memref<2x1x16xf32, #tpu.memory_space<vmem>>, vector<1x1x16xf32>
    %72 = vector.shape_cast %71 : vector<1x1x16xf32> to vector<1x16xf32>
    %73 = vector.shape_cast %56 : vector<1x16xf32> to vector<1x1x16xf32>
    tpu.vector_store %arg8[%c1_58, %c0_59, %c0_60], %73 {strides = array<i32>} : memref<2x1x16xf32, #tpu.memory_space<vmem>>, vector<1x1x16xf32>,
    %cst_61 = arith.constant dense<0.000000e+00> : vector<8x16xf32>
    %74 = tpu.matmul %48, %61, %cst_61 {dimension_numbers = #tpu.dot_dimension_numbers<[1], [0], [0], [1], [0, 0, 1, 1], [], []>} : vector<8x16xf32>, vector<16x16xf32>, vector<8x16xf32> -> vector<8x16xf32>
    %c1_62 = arith.constant 1 : index
    %c0_63 = arith.constant 0 : index
    %c0_64 = arith.constant 0 : index
    %75 = vector.load %arg10[%c1_62, %c0_63, %c0_64] : memref<2x8x16xf32, #tpu.memory_space<vmem>>, vector<1x8x16xf32>
    %76 = vector.shape_cast %75 : vector<1x8x16xf32> to vector<8x16xf32>
    %77 = vector.broadcast %58 : vector<1x16xf32> to vector<8x16xf32>
    %78 = arith.mulf %77, %76 : vector<8x16xf32>
    %79 = arith.addf %78, %74 : vector<8x16xf32>
    %c1_65 = arith.constant 1 : index
    %c0_66 = arith.constant 0 : index
    %c0_67 = arith.constant 0 : index
    %80 = vector.load %arg10[%c1_65, %c0_66, %c0_67] : memref<2x8x16xf32, #tpu.memory_space<vmem>>, vector<1x8x16xf32>
    %81 = vector.shape_cast %80 : vector<1x8x16xf32> to vector<8x16xf32>
    %82 = vector.shape_cast %79 : vector<8x16xf32> to vector<1x8x16xf32>
    tpu.vector_store %arg10[%c1_65, %c0_66, %c0_67], %82 {strides = array<i32>} : memref<2x8x16xf32, #tpu.memory_space<vmem>>, vector<1x8x16xf32>,
    %c0_i32_68 = arith.constant 0 : i32
    %83 = arith.cmpi eq, %arg3, %c0_i32_68 : i32
    %84 = arith.extui %83 : i1 to i32
    %c0_i32_69 = arith.constant 0 : i32
    %85 = arith.cmpi ne, %84, %c0_i32_69 : i32
    scf.if %85 {
      %c0_70 = arith.constant 0 : index
      %c0_71 = arith.constant 0 : index
      %c0_72 = arith.constant 0 : index
      %86 = vector.load %arg9[%c0_70, %c0_71, %c0_72] : memref<2x1x16xf32, #tpu.memory_space<vmem>>, vector<2x1x16xf32>
      %87 = tpu.reciprocal %86 {approx = true} : vector<2x1x16xf32> -> vector<2x1x16xf32>
      %c0_73 = arith.constant 0 : index
      %c0_74 = arith.constant 0 : index
      %c0_75 = arith.constant 0 : index
      %88 = vector.load %arg10[%c0_73, %c0_74, %c0_75] : memref<2x8x16xf32, #tpu.memory_space<vmem>>, vector<2x8x16xf32>
      %89 = vector.broadcast %87 : vector<2x1x16xf32> to vector<2x8x16xf32>
      %90 = arith.mulf %88, %89 : vector<2x8x16xf32>
      %c0_76 = arith.constant 0 : index
      %c0_77 = arith.constant 0 : index
      %c0_78 = arith.constant 0 : index
      %c0_79 = arith.constant 0 : index
      %91 = vector.load %arg7[%c0_76, %c0_77, %c0_78, %c0_79] : memref<1x2x8x16xf32, #tpu.memory_space<vmem>>, vector<1x2x8x16xf32>
      %92 = vector.shape_cast %91 : vector<1x2x8x16xf32> to vector<2x8x16xf32>
      %93 = vector.shape_cast %90 : vector<2x8x16xf32> to vector<1x2x8x16xf32>
      tpu.vector_store %arg7[%c0_76, %c0_77, %c0_78, %c0_79], %93 {strides = array<i32>} : memref<1x2x8x16xf32, #tpu.memory_space<vmem>>, vector<1x2x8x16xf32>,
    } else {
    }
    return
  }
  func.func @transform_0(%arg0: i32, %arg1: i32, %arg2: i32, %arg3: i32) -> (i32, i32, i32, i32) {
    %c0_i32 = arith.constant 0 : i32
    %c0_i32_0 = arith.constant 0 : i32
    return %arg0, %arg1, %c0_i32, %arg2 : i32, i32, i32, i32
  }
  func.func @transform_1(%arg0: i32, %arg1: i32, %arg2: i32, %arg3: i32) -> (i32, i32, i32, i32) {
    %c1_i32 = arith.constant 1 : i32
    %0 = arith.addi %c1_i32, %arg1 : i32
    %c0_i32 = arith.constant 0 : i32
    %c0_i32_0 = arith.constant 0 : i32
    return %arg0, %0, %c0_i32, %arg3 : i32, i32, i32, i32
  }
  func.func @transform_2(%arg0: i32, %arg1: i32, %arg2: i32, %arg3: i32) -> (i32, i32, i32, i32) {
    %c2_i32 = arith.constant 2 : i32
    %0 = arith.addi %c2_i32, %arg1 : i32
    %c0_i32 = arith.constant 0 : i32
    %c0_i32_0 = arith.constant 0 : i32
    return %arg0, %0, %c0_i32, %arg3 : i32, i32, i32, i32
  }
  func.func @transform_3(%arg0: i32, %arg1: i32, %arg2: i32, %arg3: i32) -> (i32, i32, i32, i32) {
    %c0_i32 = arith.constant 0 : i32
    %c0_i32_0 = arith.constant 0 : i32
    return %arg0, %arg1, %c0_i32, %arg2 : i32, i32, i32, i32
  }
}

</mosaic_0001>

<bundles_post_ra>
// kernel: tpu_custom_call.1
= control target key start
LH: loop header
LB: loop body
LE: loop exit
PB: predicated region body
PF: predicated region fallthrough
CT: control target
= control target key end

     0   :  { %s1645_s0 = inlined_call_operand.hbm [shape: f32[2,6,8,16], index: 0, kind: input, shape index: {}]   ;;  %s1646_s1 = inlined_call_operand.hbm [shape: f32[2,6,8,16], index: 1, kind: input, shape index: {}]   ;;  %s1647_s2 = inlined_call_operand.hbm [shape: f32[2,6,8,16], index: 2, kind: input, shape index: {}]   ;;  %s1648_s3 = inlined_call_operand.hbm [shape: f32[2,2,8,16], index: 3, kind: output, shape index: {}]  }
   0x1   :  { %1653 = sst [smem:[#allocation18_spill]] %s1645_s0 }
   0x2   :  { %1654 = sst [smem:[#allocation19_spill]] %s1646_s1 }
   0x3   :  { %8 = vsyncpa [#allocation6], 0 }
   0x4   :  { %10 = vsyncpa [#allocation6 + $0x1], 0 }
   0x5   :  { %11 = vsyncpa [#allocation9], 0 }
   0x6   :  { %13 = vsyncpa [#allocation9 + $0x1], 0 }
   0x7   :  { %14 = vsyncpa [#allocation7], 0 }
   0x8   :  { %16 = vsyncpa [#allocation7 + $0x1], 0  ;;  %s1387_s12 = smov 0   ;;  %s1389_s13 = smov 0  }
   0x9   :  { %s1391_s14 = smov 0   ;;  %s1393_s15 = smov 0  }
   0xa   :  { %s1395_s16 = smov 0   ;;  %s1397_s17 = smov 0  }
   0xb LB: > { %1655 = sst [smem:[#allocation15_spill]] %s1350_s16  ;;  %s1418_s18 = sadd.s32 4294967295, %s1354_s17   ;;  %s1354_s17 = sphi %s1397_s17, %s22_s17   ;;  %s1350_s16 = sphi %s1395_s16, %s1669_s16   ;;  %s1346_s15 = sphi %s1393_s15, %s1668_s15   ;;  %s1342_s14 = sphi %s1391_s14, %s1672_s14   ;;  %s1338_s13 = sphi %s1389_s13, %s1671_s13   ;;  %s1334_s12 = sphi %s1387_s12, %s1670_s12  }
   0xc   : > { %s1023_s19 = sadd.s32 4294967294, %s1354_s17   ;;  %s48_s20 = sadd.s32 1, %s1350_s16 }
   0xd   : > { %s59_s21 = sadd.s32 1, %s1342_s14  ;;  %p50_p0 = scmp.ge.s32.totalorder %s48_s20, 2 }
   0xe   : > { %p66_p1 = scmp.ne.s32.totalorder %s1342_s14, %s1338_s13  ;;  %p67_p2 = scmp.eq.s32.totalorder %s1354_s17, 0 }
   0xf   : > { %p72_p3 = scmp.ne.s32.totalorder %s1338_s13, %s1334_s12  ;;  %s1674_s20 = smov (%p50_p0, %s48_s20), 0 }
  0x10   : > { %1656 = sst [smem:[#allocation16_spill]] %s1674_s20  ;;  %p1430_p4 = por %p67_p2, %p66_p1 }
  0x11   : > { %p73_p5 = scmp.eq.s32.totalorder %s1418_s18, 0  ;;  %s52_s23 = ssub.s32 %s1350_s16, %s1674_s20 }
  0x12   : > { %p164_p6 = scmp.eq.s32.totalorder %s1418_s18, 1  ;;  %p57_p7 = scmp.eq.s32.totalorder %s52_s23, 0 }
  0x13   : > { %p1438_p8 = por %p73_p5, %p72_p3  ;;  %p170_p10 = scmp.eq.s32.totalorder %s1023_s19, 1 }
  0x14   : > { %p1442_p9 = por %p164_p6, %p66_p1  ;;  %p1025_p12 = scmp.ge.s32.totalorder %s1354_s17, 2 }
  0x15   : > { %s1447_s26 = scalar_select %p57_p7, %s1342_s14, %s59_s21  }
  0x16   : > { %p1449_p11 = por %p170_p10, %p72_p3  ;;  %p1111_p13 = scmp.lt.s32.totalorder %s1354_s17, 2 }
  0x17   : > { %1660 = sst [smem:[#allocation17_spill]] %s1447_s26  ;;  %s190_s28 = sand.u32 1, %s1342_s14  }
  0x18   : > { %s1458_s29 = sshll.u32 %s190_s28, 4  ;;  %s1461_s30 = smul.u32 768, %s1350_s16 }
  0x19   : > { %p1465_p0 = pnand %p1111_p13, %p1430_p4  ;;  %s214_s5 = sand.u32 1, %s1354_s17  }
  0x1a   : > { %s1663_s1 = sld [smem:[#allocation19_spill]]  ;;  %s218_s10 = scalar_lea.vmem [#allocation8], %s1458_s29 }
  0x1b   : > { %s229_s11 = sshll.u32 %s218_s10, 4  ;;  %p1032_p1 = scmp.ge.s32.totalorder %s1354_s17, 1  ;;  %s230_s11 = int_to_ptr.vmem [resolvable:$true] %s229_s11 }
  0x1c   : > { %s1476_s19 = scalar_lea.sflag [#allocation9], %s214_s5  ;;  %p1186_p2 = pneg %p1465_p0 }
  0x1d   : > { %s1197_s21 = scalar_lea.vmem %s230_s11, 256  ;;  %s1356_s22 = smov [#allocation8]  }
  0x1e   : > { %p1198_p3 = scmp.ne.s32.totalorder %s230_s11, %s1197_s21  ;;  %s1202_s23 = sshll.u32 %s1356_s22, 4  ;;  %s1203_s23 = int_to_ptr.vmem [resolvable:$false] %s1202_s23 }
  0x1f   : > { %s1204_s6 = scalar_lea.vmem %s1203_s23, 512  ;;  %p1205_p6 = scmp.lt.s32.totalorder %s230_s11, %s1203_s23 }
  0x20   : > { %s921_s8 = scalar_lea.hbm %s1663_s1, %s1461_s30  ;;  %p1200_p4 = pnand %p1198_p3, %p1186_p2 }
  0x21   : > { %s922_s9 = scalar_lea.hbm %s921_s8, 256  ;;  %p1206_p7 = scmp.lt.s32.totalorder %s1204_s6, %s1197_s21 }
  0x22   : > { %p1201_p5 = pneg %p1200_p4 }
  0x23   : > { %p1207_p10 = por %p1206_p7, %p1205_p6 }
  0x25   : > { %p1208_p13 = pnand %p1207_p10, %p1201_p5 }
  0x27   : > { %1211 = shalt.err (!%p1208_p13)
}
  0x28   : > { %s1650_s7 = smov 128   ;;  %s1358_s5 = smov 8  }
  0x29   : > { %1103 = dma.hbm_to_vmem [thread:$0]  (!%p1465_p0), %s922_s9, 256, %s230_s11, %s1476_s19, %s1650_s7, %s1650_s7, %s1358_s5  }
  0x2a   : > { %p262_p3 = scmp.lt.s32.totalorder %s1354_s17, 3  ;;  %s1665_s0 = sld [smem:[#allocation18_spill]] }
  0x2b   : > { %s194_s23 = scalar_lea.vmem [#allocation5], %s1458_s29  ;;  %s191_s1 = scalar_lea.sflag [#allocation6], %s190_s28 }
  0x2c   : > { %p1492_p4 = pnand %p1032_p1, %p262_p3  ;;  %s204_s6 = sshll.u32 %s194_s23, 4  ;;  %s205_s6 = int_to_ptr.vmem [resolvable:$true] %s204_s6 }
  0x2d   : > { %s1226_s20 = scalar_lea.vmem %s205_s6, 256  ;;  %s1359_s9 = smov [#allocation5]  }
  0x2e   : > { %p1227_p5 = scmp.ne.s32.totalorder %s205_s6, %s1226_s20  ;;  %s1231_s11 = sshll.u32 %s1359_s9, 4  ;;  %s1232_s11 = int_to_ptr.vmem [resolvable:$false] %s1231_s11 }
  0x2f   : > { %s1233_s7 = scalar_lea.vmem %s1232_s11, 512  ;;  %p1234_p1 = scmp.lt.s32.totalorder %s205_s6, %s1232_s11 }
  0x30   : > { %s203_s22 = scalar_lea.hbm %s1665_s0, %s1461_s30  ;;  %p1229_p6 = pnand %p1227_p5, %p1186_p2 }
  0x31   : > { %p1235_p10 = scmp.lt.s32.totalorder %s1233_s7, %s1226_s20 }
  0x32   : > { %p1230_p7 = pneg %p1229_p6 }
  0x33   : > { %p1236_p13 = por %p1235_p10, %p1234_p1 }
  0x35   : > { %p1237_p3 = pnand %p1236_p13, %p1230_p7 }
  0x37   : > { %1240 = shalt.err (!%p1237_p3)
}
  0x38   : > { %s1666_s10 = smov 128   ;;  %s931_s23 = scalar_lea.hbm %s1647_s2, %s1461_s30 }
  0x39   : > { %1100 = dma.hbm_to_vmem [thread:$0]  (!%p1465_p0), %s203_s22, 256, %s205_s6, %s191_s1, %s1666_s10, %s1666_s10, %s1358_s5  }
  0x3a   : > { %s243_s9 = scalar_lea.vmem [#allocation10], %s1458_s29  ;;  %s932_s11 = scalar_lea.hbm %s931_s23, 512 }
  0x3b   : > { %s254_s0 = sshll.u32 %s243_s9, 4  ;;  %s1360_s7 = smov [#allocation10]   ;;  %s255_s0 = int_to_ptr.vmem [resolvable:$true] %s254_s0 }
  0x3c   : > { %s1254_s20 = scalar_lea.vmem %s255_s0, 256  ;;  %s1259_s16 = sshll.u32 %s1360_s7, 4  ;;  %s1260_s16 = int_to_ptr.vmem [resolvable:$false] %s1259_s16 }
  0x3d   : > { %p1255_p5 = scmp.ne.s32.totalorder %s255_s0, %s1254_s20  ;;  %s1261_s26 = scalar_lea.vmem %s1260_s16, 512 }
  0x3e   : > { %p1262_p1 = scmp.lt.s32.totalorder %s255_s0, %s1260_s16  ;;  %p1263_p10 = scmp.lt.s32.totalorder %s1261_s26, %s1254_s20 }
  0x3f   : > { %p1257_p6 = pnand %p1255_p5, %p1186_p2 }
  0x40   : > { %p1264_p13 = por %p1263_p10, %p1262_p1 }
  0x41   : > { %p1258_p7 = pneg %p1257_p6 }
  0x43   : > { %p1265_p3 = pnand %p1264_p13, %p1258_p7 }
  0x45   : > { %1268 = shalt.err (!%p1265_p3)
}
  0x46   : > { %1106 = dma.hbm_to_vmem [thread:$0]  (!%p1465_p0), %s932_s11, 256, %s255_s0, %s1476_s19, %s1666_s10, %s1666_s10, %s1358_s5  }
  0x47   : > { %266 = sbr.rel (%p1492_p4) target bundleno = 675 (0x2a3), region = 32  ;;  %s1528_s1 = sand.u32 (!%p1492_p4), 1, %s1338_s13  }
  0x48   : > { %s1531_s16 = sshll.u32 (!%p1492_p4), %s1528_s1, 4  ;;  %s269_s26 = scalar_lea.sflag (!%p1492_p4), [#allocation6], %s1528_s1 }
  0x49   : > { %s272_s29 = scalar_lea.vmem (!%p1492_p4), [#allocation5], %s1531_s16 }
  0x4c   : > { %1321 = dma.done.wait (%p1438_p8), %s269_s26, 256  }
  0x4d   : > { %1323 = vsyncadd (%p1438_p8), %s269_s26, 4294967040  ;;  %s277_s0 = sand.u32 1, %s1418_s18   ;;  %s281_s4 = scalar_lea.vmem [#allocation8], %s1531_s16 }
  0x4e   : > { %s278_s30 = scalar_lea.sflag [#allocation9], %s277_s0 }
  0x4f   : > { %1325 = dma.done.wait (%p1438_p8), %s278_s30, 512  }
  0x50   : > { %1327 = vsyncadd (%p1438_p8), %s278_s30, 4294966784  ;;  %v342_v0 = vld [vmem:[%s281_s4] sm:$0xff]  ;;  %v1041_v2 = vld [vmem:[%s281_s4 + $0x8] sm:$0xff]  ;;  %vm376_vm0 = vcmask 64512   ;;  %vm333_vm1 = vcmask 122880   ;;  %v1361_v8 = vmov -inf   ;;  %v476_v21 = vlaneseq }
  0x51   : > { %v341_v1 = vld [vmem:[%s272_s29] sm:$0xff]  ;;  %344 = vxpose.xlu0.b32.start.end [1/1] (short) (narrow) %v342_v0, 16  ;;  %v1040_v3 = vld [vmem:[%s272_s29 + $0x8] sm:$0xff]  ;;  %334 = vst.msk [vmem:[#allocation2] sm:$0x1] %vm333_vm1, %v1361_v8  ;;  %vm338_vm2 = vcmask 130048  }
  0x52   : > { %1064 = vmatprep.subr.mxu0 %v341_v1  ;;  %335 = vst.msk [vmem:[#allocation2 + $0x1] sm:$0x1] %vm333_vm1, %v1361_v8  ;;  %v1362_v9 = vmov 0.0   ;;  %vm1363_vm3 = vmmov 0   ;;  %v477_v28 = vshrl.u32 %v476_v21, 7  ;;  %s290_s18 = scalar_lea.vmem [#allocation10], %s1531_s16 }
  0x53   : > { %1065 = vmatpush3.msra.mxu0 %v341_v1  ;;  %336 = vst.msk [vmem:[#allocation3] sm:$0x1] %vm333_vm1, %v1362_v9  ;;  %337 = vst.msk [vmem:[#allocation3 + $0x1] sm:$0x1] %vm333_vm1, %v1362_v9  ;;  %1069 = vmatprep.subr.mxu1 %v1362_v9  ;;  %v343_v60 = vld [vmem:[%s290_s18] sm:$0xff]  ;;  %s322_s24 = scalar_lea.vmem [#allocation11], %s1531_s16 }
  0x54   : > { %1076 = vmatprep.subr.mxu0 %v1040_v3  ;;  %339 = vst.msk [vmem:[#allocation4] sm:$0xff] %vm338_vm2, %v1362_v9  ;;  %340 = vst.msk [vmem:[#allocation4 + $0x8] sm:$0xff] %vm338_vm2, %v1362_v9  ;;  %1073 = vmatprep.mubr.msk.f32.mxu1 %vm1363_vm3, %v1362_v9  ;;  %v1562_v34 = vsub.s32 0, %v477_v28  ;;  %s1051_s19 = sshll.u32 %s1346_s15, 8  ;;  %s874_s5 = sshll.u32 %s322_s24, 4  ;;  %s1596_s5 = int_to_ptr.vmem [resolvable:$true] %s874_s5 }
  0x55   : > { %s1594_s6 = scalar_lea.hbm %s1648_s3, %s1051_s19  ;;  %s858_s10 = scalar_lea.sflag [#allocation7], %s1528_s1 }
  0x56   : > { %591 = vxpose.xlu0.b32.start.end [1/1] (short) (narrow) %v1041_v2, 16  ;;  %s1270_s28 = scalar_lea.vmem %s1596_s5, 256  ;;  %s1364_s15 = smov [#allocation11]  }
  0x57   : > { %p1271_p8 = scmp.ne.s32.totalorder %s1596_s5, %s1270_s28  ;;  %s1274_s21 = sshll.u32 %s1364_s15, 4  ;;  %s1275_s21 = int_to_ptr.vmem [resolvable:$false] %s1274_s21 }
  0x58   : > { %v460_v32 = vld [vmem:[#allocation2] sm:$0x1]  ;;  %s1276_s23 = scalar_lea.vmem %s1275_s21, 512  ;;  %p1277_p4 = scmp.lt.s32.totalorder %s1596_s5, %s1275_s21 }
  0x59   : > { %v707_v43 = vld [vmem:[#allocation2 + $0x1] sm:$0x1]  ;;  %p1272_p0 = pnand %p1271_p8, %p1442_p9  ;;  %p1278_p5 = scmp.lt.s32.totalorder %s1276_s23, %s1270_s28 }
  0x5a   : > { %v734_v21 = vld [vmem:[#allocation3 + $0x1] sm:$0x1] }
  0x5b   : > { %p1273_p2 = pneg %p1272_p0  ;;  %p1279_p6 = por %p1278_p5, %p1277_p4 }
  0x5d   : > { %p1280_p7 = pnand %p1279_p6, %p1273_p2 }
  0xcd   : > { %v360_v4 = vpop.trf.xlu0 }
  0xce   : > { %1066 = vmatprep.mubr.msk.f32.mxu0 %vm376_vm0, %v360_v4 }
  0xd1   : > { %v361_v5 = vpop.trf.xlu0 }
  0xd2   : > { %1067 = vmatmul.mubr.msk.f32.vlgmr.msra.gmra.mxu0 %vm376_vm0, %v361_v5 }
  0xd3   : > { %1077 = vmatpush3.msra.mxu0 %v1040_v3 }
  0xd5   : > { %v607_v6 = vpop.trf.xlu0 }
  0xd6   : > { %1078 = vmatprep.mubr.msk.f32.mxu0 %vm376_vm0, %v607_v6  ;;  %v1042_v6 = vld [vmem:[%s290_s18 + $0x8] sm:$0xff] }
  0xd9   : > { %v608_v7 = vpop.trf.xlu0 }
  0xda   : > { %1079 = vmatmul.mubr.msk.f32.vlgmr.msra.gmra.mxu0 %vm376_vm0, %v608_v7 }
 0x192   : > { %v1068_v10 = vpop.f32.mrf.mxu0 }
 0x193   : > { %v459_v11 = vmul.f32 0.35355338, %v1068_v10 }
 0x194   : > { %v449_v12 = vpop.f32.mrf.mxu0 }
 0x195   : > { %v458_v13 = vmul.f32 0.35355338, %v449_v12  ;;  %v463_v14 = vsel %vm338_vm2, %v459_v11, -inf }
 0x197   : > { %v462_v15 = vsel %vm338_vm2, %v458_v13, -inf }
 0x198   : > { %v464_v16 = vmax.f32 %v462_v15, %v463_v14 }
 0x19a   : > { %v465_v17 = vrot.slane %v464_v16, 4  ;;  %v1080_v18 = vpop.f32.mrf.mxu0 }
 0x19b   : > { %v705_v19 = vmul.f32 0.35355338, %v1080_v18 }
 0x19c   : > { %v466_v20 = vmax.f32 %v464_v16, %v465_v17  ;;  %v695_v22 = vpop.f32.mrf.mxu0 }
 0x19d   : > { %v704_v23 = vmul.f32 0.35355338, %v695_v22  ;;  %v709_v25 = vsel %vm338_vm2, %v705_v19, -inf }
 0x19e   : > { %v467_v24 = vrot.slane %v466_v20, 2 }
 0x19f   : > { %v708_v26 = vsel %vm338_vm2, %v704_v23, -inf }
 0x1a0   : > { %v468_v27 = vmax.f32 %v466_v20, %v467_v24  ;;  %v710_v29 = vmax.f32 %v708_v26, %v709_v25 }
 0x1a2   : > { %v469_v30 = vrot.slane %v468_v27, 1  ;;  %v711_v31 = vrot.slane %v710_v29, 4 }
 0x1a4   : > { %v470_v33 = vmax.f32 %v468_v27, %v469_v30  ;;  %v712_v35 = vmax.f32 %v710_v29, %v711_v31  ;;  %v575_v27 = vld [vmem:[#allocation4] sm:$0xff] }
 0x1a6   : > { %v471_v36 = vmax.f32 %v460_v32, %v470_v33  ;;  %v713_v37 = vrot.slane %v712_v35, 2 }
 0x1a8   : > { %v479_v38 = vrot.slane %v471_v36, %v1562_v34  ;;  %501 = vst.msk [vmem:[#allocation2] sm:$0x1] %vm333_vm1, %v471_v36  ;;  %v714_v39 = vmax.f32 %v712_v35, %v713_v37  ;;  %v472_v49 = vsub.f32 %v460_v32, %v471_v36  ;;  %v822_v35 = vld [vmem:[#allocation4 + $0x8] sm:$0xff] }
 0x1aa   : > { %v481_v40 = vsub.f32 %v458_v13, %v479_v38  ;;  %v482_v41 = vsub.f32 %v459_v11, %v479_v38  ;;  %v715_v42 = vrot.slane %v714_v39, 1  ;;  %v473_v54 = vmul.f32 1.442695, %v472_v49  ;;  %v487_v11 = vld [vmem:[#allocation3] sm:$0x1] }
 0x1ac   : > { %v483_v44 = vmul.f32 1.442695, %v481_v40  ;;  %v485_v45 = vmul.f32 1.442695, %v482_v41  ;;  %v716_v46 = vmax.f32 %v714_v39, %v715_v42 }
 0x1ae   : > { %1168 = vpow2.f32 %v483_v44  ;;  %v717_v47 = vmax.f32 %v707_v43, %v716_v46 }
 0x1af   : > { %1170 = vpow2.f32 %v485_v45 }
 0x1b0   : > { %v725_v48 = vrot.slane %v717_v47, %v1562_v34  ;;  %747 = vst.msk [vmem:[#allocation2 + $0x1] sm:$0x1] %vm333_vm1, %v717_v47  ;;  %v718_v55 = vsub.f32 %v707_v43, %v717_v47 }
 0x1b2   : > { %v727_v50 = vsub.f32 %v704_v23, %v725_v48  ;;  %v728_v51 = vsub.f32 %v705_v19, %v725_v48  ;;  %v719_v62 = vmul.f32 1.442695, %v718_v55 }
 0x1b4   : > { %v729_v52 = vmul.f32 1.442695, %v727_v50  ;;  %v731_v53 = vmul.f32 1.442695, %v728_v51 }
 0x1b6   : > { %1172 = vpow2.f32 %v729_v52 }
 0x1b7   : > { %1174 = vpow2.f32 %v731_v53 }
 0x1b8   : > { %1176 = vpow2.f32 %v473_v54 }
 0x1b9   : > { %1178 = vpow2.f32 %v719_v62 }
 0x1bb   : > { %v1169_v56 = vpop.eup %1168 }
 0x1bc   : > { %v1171_v57 = vpop.eup %1170  ;;  %v489_v58 = vsel %vm338_vm2, %v1169_v56, 0.0 }
 0x1bd   : > { %v490_v59 = vsel %vm338_vm2, %v1171_v57, 0.0  ;;  %1070 = vmatpush3.msra.mxu1 %v1171_v57 }
 0x1be   : > { %v491_v61 = vadd.f32 %v490_v59, %v489_v58  ;;  %1071 = vmatprep.subr.mxu1 %v1362_v9 }
 0x1bf   : > { %1072 = vmatpush3.msra.mxu1 %v1169_v56 }
 0x1c0   : > { %v492_v63 = vrot.slane %v491_v61, 4  ;;  %1074 = vmatmul.mubr.msk.f32.vlgmr.msra.gmra.mxu1 %vm338_vm2, %v343_v60  ;;  %1081 = vmatprep.subr.mxu1 %v1362_v9 }
 0x1c1   : > { %1085 = vmatprep.mubr.msk.f32.mxu1 %vm1363_vm3, %v1362_v9 }
 0x1c2   : > { %v493_v0 = vadd.f32 %v492_v63, %v491_v61 }
 0x1c3   : > { %v1173_v1 = vpop.eup %1172 }
 0x1c4   : > { %v1175_v2 = vpop.eup %1174  ;;  %v494_v3 = vrot.slane %v493_v0, 2  ;;  %v736_v4 = vsel %vm338_vm2, %v1173_v1, 0.0 }
 0x1c5   : > { %v737_v5 = vsel %vm338_vm2, %v1175_v2, 0.0  ;;  %1082 = vmatpush3.msra.mxu1 %v1175_v2  ;;  %v1177_v10 = vpop.eup %1176 }
 0x1c6   : > { %v495_v7 = vadd.f32 %v494_v3, %v493_v0  ;;  %v738_v8 = vadd.f32 %v737_v5, %v736_v4  ;;  %1083 = vmatprep.subr.mxu1 %v1362_v9  ;;  %v488_v16 = vmul.f32 %v1177_v10, %v487_v11  ;;  %v1179_v20 = vpop.eup %1178  ;;  %v580_v26 = vrot.slane %v1177_v10, %v1562_v34 }
 0x1c7   : > { %1084 = vmatpush3.msra.mxu1 %v1173_v1  ;;  %v735_v9 = vmul.f32 %v1179_v20, %v734_v21  ;;  %v827_v33 = vrot.slane %v1179_v20, %v1562_v34 }
 0x1c8   : > { %v496_v12 = vrot.slane %v495_v7, 1  ;;  %v739_v13 = vrot.slane %v738_v8, 4  ;;  %1086 = vmatmul.mubr.msk.f32.vlgmr.msra.gmra.mxu1 %vm338_vm2, %v1042_v6  ;;  %v582_v29 = vmul.f32 %v580_v26, %v575_v27 }
 0x1c9   : > { %v829_v37 = vmul.f32 %v827_v33, %v822_v35 }
 0x1ca   : > { %v497_v14 = vadd.f32 %v496_v12, %v495_v7  ;;  %v740_v15 = vadd.f32 %v739_v13, %v738_v8 }
 0x1cc   : > { %v741_v17 = vrot.slane %v740_v15, 2  ;;  %v498_v18 = vadd.f32 %v497_v14, %v488_v16 }
 0x1ce   : > { %v742_v19 = vadd.f32 %v741_v17, %v740_v15  ;;  %500 = vst.msk [vmem:[#allocation3] sm:$0x1] %vm333_vm1, %v498_v18 }
 0x1d0   : > { %v743_v22 = vrot.slane %v742_v19, 1 }
 0x1d2   : > { %v744_v23 = vadd.f32 %v743_v22, %v742_v19 }
 0x1d4   : > { %v745_v24 = vadd.f32 %v744_v23, %v735_v9 }
 0x1d5   : > { %v835_v25 = vld [vmem:[#allocation3] sm:$0x1] }
 0x1d6   : > { %746 = vst.msk [vmem:[#allocation3 + $0x1] sm:$0x1] %vm333_vm1, %v745_v24  ;;  %1180 = vrcp.f32 %v835_v25 }
 0x1dd   : > { %v836_v28 = vld [vmem:[#allocation3 + $0x1] sm:$0x1] }
 0x1de   : > { %1182 = vrcp.f32 %v836_v28 }
 0x1e3   : > { %v1181_v36 = vpop.eup %1180 }
 0x1e4   : > { %v846_v40 = vrot.slane %v1181_v36, %v1562_v34 }
 0x1eb   : > { %v1183_v44 = vpop.eup %1182 }
 0x1ec   : > { %v850_v45 = vrot.slane %v1183_v44, %v1562_v34 }
 0x280   : > { %v571_v30 = vpop.f32.mrf.mxu1 }
 0x281   : > { %v583_v31 = vadd.f32 %v582_v29, %v571_v30 }
 0x282   : > { %v1075_v32 = vpop.f32.mrf.mxu1 }
 0x283   : > { %584 = vst.msk [vmem:[#allocation4] sm:$0xff] %vm338_vm2, %v583_v31 }
 0x288   : > { %v817_v38 = vpop.f32.mrf.mxu1 }
 0x289   : > { %v830_v39 = vadd.f32 %v829_v37, %v817_v38 }
 0x28a   : > { %v1087_v41 = vpop.f32.mrf.mxu1  ;;  %v839_v42 = vld [vmem:[#allocation4] sm:$0xff] }
 0x28b   : > { %831 = vst.msk [vmem:[#allocation4 + $0x8] sm:$0xff] %vm338_vm2, %v830_v39  ;;  %v853_v43 = vmul.f32 %v846_v40, %v839_v42 }
 0x28d   : > { %855 = vst.msk [vmem:[%s322_s24] sm:$0xff] %vm338_vm2, %v853_v43 }
 0x292   : > { %v840_v46 = vld [vmem:[#allocation4 + $0x8] sm:$0xff] }
 0x293   : > { %v854_v47 = vmul.f32 %v850_v45, %v840_v46 }
 0x295   : > { %856 = vst.msk [vmem:[%s322_s24 + $0x8] sm:$0xff] %vm338_vm2, %v854_v47 }
 0x296   : > { %1283 = shalt.err (!%p1280_p7)
}
 0x297   : > { %s1284_s9 = scalar_lea.hbm %s1594_s6, 256  ;;  %s1288_s7 = scalar_lea.hbm %s1648_s3, 512 }
 0x298   : > { %p1285_p1 = scmp.ne.s32.totalorder %s1594_s6, %s1284_s9  ;;  %p1289_p3 = scmp.lt.s32.totalorder %s1594_s6, %s1648_s3 }
 0x299   : > { %p1290_p8 = scmp.lt.s32.totalorder %s1288_s7, %s1284_s9 }
 0x29a   : > { %p1286_p10 = pnand %p1285_p1, %p1442_p9 }
 0x29b   : > { %p1291_p0 = por %p1290_p8, %p1289_p3 }
 0x29c   : > { %p1287_p13 = pneg %p1286_p10 }
 0x29e   : > { %p1292_p2 = pnand %p1291_p0, %p1287_p13 }
 0x2a0   : > { %1295 = shalt.err (!%p1292_p2)
}
 0x2a1   : > { %s1365_s29 = smov 128   ;;  %s1366_s0 = smov 8  }
 0x2a2   : > { %1095 = dma.vmem_to_hbm [thread:$0]  (%p1442_p9), %s1596_s5, 256, %s1594_s6, %s858_s10, %s1365_s29, %s1365_s29, %s1366_s0  }
 0x2a3 PF: > { %s889_s30 = sand.u32 1, %s1334_s12   ;;  %p1108_p4 = pnand %p1025_p12, %p1449_p11 }
 0x2a4   : > { %s890_s4 = scalar_lea.sflag [#allocation7], %s889_s30 }
 0x2a5   : > { %p1109_p5 = pneg %p1108_p4 }
 0x2a7   : > { %1329 = dma.done.wait (%p1109_p5), %s890_s4, 256  }
 0x2a8   : > { %1331 = vsyncadd (%p1109_p5), %s890_s4, 4294967040  ;;  %s22_s17 = sadd.s32 1, %s1354_s17   ;;  %s1667_s25 = sld [smem:[#allocation17_spill]] }
 0x2a9   : > { %p19_p6 = scmp.ge.s32.totalorder %s22_s17, 4   ;;  %s1668_s15 = sld [smem:[#allocation15_spill]] }
 0x2aa   : > { %s1669_s16 = sld [smem:[#allocation16_spill]]  ;;  %s1670_s12 = smov %s1338_s13 }
 0x2ab   : > { %s1671_s13 = smov %s1342_s14  ;;  %21 = sbr.rel (!%p19_p6) target bundleno = 11 (0xb), region = 115 }
 0x2ae   : > { %s1672_s14 = smov %s1667_s25 }
 0x2b0   :  { %895 = vsyncpa [#allocation6], 1 }
 0x2b1   :  { %897 = vsyncpa [#allocation6 + $0x1], 1 }
 0x2b2   :  { %898 = vsyncpa [#allocation9], 1 }
 0x2b3   :  { %900 = vsyncpa [#allocation9 + $0x1], 1 }
 0x2b4   :  { %901 = vsyncpa [#allocation7], 1 }
 0x2b5   :  { %903 = vsyncpa [#allocation7 + $0x1], 1 }

</bundles_post_ra>
